<compile_context>
chip_gen: v6e
topology: v6e:2x2x1
jax: 0.10.0
libtpu: 0.0.40
codegen_flags: <defaults>
</compile_context>

<pallas_src>
import math

import jax
import jax.numpy as jnp
from jax.experimental import pallas as pl
from jax.experimental.pallas import tpu as pltpu  # noqa: F401  (kept for TPU-specific knobs)


def gru_cell_kernel(xh_ref, h_ref, w_ref, b_ref, h_new_ref):
    """One fused-GRU step.

    xh_ref: (B, I+H) f32   concat([x, h], -1)
    h_ref : (B, H)   f32   previous hidden state (also used for z*h)
    w_ref : (I+H, 4H) f32  fused gate weights  [r | z | gi_n | gh_n]
    b_ref : (1, 4H)  f32   fused gate biases   [b_r | b_z | b_in | b_hn]
    h_new_ref: (B, H) f32  new hidden state (== GRU output)
    """
    h = h_ref[...]                                   # (B, H)
    hidden = h.shape[-1]

    # Single MXU matmul producing a lane-dense (B, 4H=128) gate pre-activation.
    g = jnp.dot(xh_ref[...], w_ref[...],
                preferred_element_type=jnp.float32) + b_ref[...]

    r_pre = g[:, 0 * hidden:1 * hidden]
    z_pre = g[:, 1 * hidden:2 * hidden]
    gi_n = g[:, 2 * hidden:3 * hidden]               # x W_in + b_in
    gh_n = g[:, 3 * hidden:4 * hidden]               # h W_hn + b_hn

    r = jax.nn.sigmoid(r_pre)
    z = jax.nn.sigmoid(z_pre)
    n = jnp.tanh(gi_n + r * gh_n)                    # b_hn stays inside r*(...)
    h_new = (1.0 - z) * n + z * h

    h_new_ref[...] = h_new.astype(h_new_ref.dtype)


def _full_spec(shape):
    # Whole-array block resident in VMEM (all shapes here are tiny).
    return pl.BlockSpec(shape, lambda: (0,) * len(shape))


def basic_net_forward(observations, rnn_hidden_states, params):
    """BasicNet.forward: returns (output, rnn_hidden_states)."""
    B, I = observations.shape
    L, Bh, H = rnn_hidden_states.shape
    assert L == 1 and Bh == B, "single-layer GRU state expected"

    h0 = rnn_hidden_states[0]                              # (B, H)
    xh = jnp.concatenate([observations, h0], axis=-1)      # (B, I+H)

    ins = (xh, h0, params["w_fused"], params["b_fused"])

    h_new = pl.pallas_call(
        gru_cell_kernel,
        out_shape=jax.ShapeDtypeStruct((B, H), jnp.float32),
        in_specs=[_full_spec(a.shape) for a in ins],
        out_specs=_full_spec((B, H)),
        # Reuse the hidden-state buffer (input idx 1) for the output.
        input_output_aliases={1: 0},
    )(*ins)

    # out == h_new for a 1-layer single-step GRU.
    return h_new, h_new[None, :, :]                        # (B, H), (1, B, H)


def init_gru_params(key, input_size, hidden_size):
    """PyTorch-style U(-1/sqrt(H), 1/sqrt(H)) init, then fuse weights/biases."""
    bound = 1.0 / math.sqrt(hidden_size)
    keys = jax.random.split(key, 12)

    def u(k, shape):
        return jax.random.uniform(k, shape, jnp.float32, -bound, bound)

    # Raw PyTorch-layout weights (stored pre-transposed: (in_features, out)).
    w_ir = u(keys[0], (input_size, hidden_size))
    w_iz = u(keys[1], (input_size, hidden_size))
    w_in = u(keys[2], (input_size, hidden_size))
    w_hr = u(keys[3], (hidden_size, hidden_size))
    w_hz = u(keys[4], (hidden_size, hidden_size))
    w_hn = u(keys[5], (hidden_size, hidden_size))
    b_ir = u(keys[6], (1, hidden_size))
    b_iz = u(keys[7], (1, hidden_size))
    b_in = u(keys[8], (1, hidden_size))
    b_hr = u(keys[9], (1, hidden_size))
    b_hz = u(keys[10], (1, hidden_size))
    b_hn = u(keys[11], (1, hidden_size))

    # Fused (I+H, 4H) weight: columns = [r | z | gi_n | gh_n].
    zeros_i = jnp.zeros((input_size, hidden_size), jnp.float32)
    zeros_h = jnp.zeros((hidden_size, hidden_size), jnp.float32)
    w_top = jnp.concatenate([w_ir, w_iz, w_in, zeros_i], axis=1)   # x rows
    w_bot = jnp.concatenate([w_hr, w_hz, zeros_h, w_hn], axis=1)   # h rows
    w_fused = jnp.concatenate([w_top, w_bot], axis=0)              # (I+H, 4H)

    # Fused (1, 4H) bias: [b_ir+b_hr | b_iz+b_hz | b_in | b_hn].
    b_fused = jnp.concatenate([b_ir + b_hr, b_iz + b_hz, b_in, b_hn], axis=1)

    raw = dict(w_ir=w_ir, w_iz=w_iz, w_in=w_in, w_hr=w_hr, w_hz=w_hz, w_hn=w_hn,
               b_ir=b_ir, b_iz=b_iz, b_in=b_in, b_hr=b_hr, b_hz=b_hz, b_hn=b_hn)
    return {"w_fused": w_fused, "b_fused": b_fused, "_raw": raw}


def _reference_gru_step(x, h, raw):
    """Pure-JAX reference matching PyTorch GRU semantics."""
    r = jax.nn.sigmoid(x @ raw["w_ir"] + raw["b_ir"] + h @ raw["w_hr"] + raw["b_hr"])
    z = jax.nn.sigmoid(x @ raw["w_iz"] + raw["b_iz"] + h @ raw["w_hz"] + raw["b_hz"])
    n = jnp.tanh(x @ raw["w_in"] + raw["b_in"] + r * (h @ raw["w_hn"] + raw["b_hn"]))
    return (1.0 - z) * n + z * h


if __name__ == "__main__":
    # BasicNet(batch_size=2, input_size=16, hidden_size=32)
    batch_size, input_size, hidden_size = 2, 16, 32

    key = jax.random.PRNGKey(0)
    k_obs, k_h, k_params = jax.random.split(key, 3)

    observations = jax.random.normal(k_obs, (batch_size, input_size), jnp.float32)
    rnn_hidden_states = jax.random.normal(
        k_h, (1, batch_size, hidden_size), jnp.float32)
    params = init_gru_params(k_params, input_size, hidden_size)

    kernel_params = {"w_fused": params["w_fused"], "b_fused": params["b_fused"]}
    output, new_hidden = jax.jit(basic_net_forward)(
        observations, rnn_hidden_states, kernel_params)
    jax.block_until_ready((output, new_hidden))

    assert output.shape == (batch_size, hidden_size)
    assert new_hidden.shape == (1, batch_size, hidden_size)

    # Correctness check against a pure-JAX PyTorch-semantics reference.
    ref = _reference_gru_step(observations, rnn_hidden_states[0], params["_raw"])
    assert jnp.allclose(output, ref, atol=1e-5, rtol=1e-5)
    assert jnp.allclose(new_hidden[0], ref, atol=1e-5, rtol=1e-5)

    print("KERNEL_OK")
</pallas_src>

<mosaic_0001>
module attributes {stable_mosaic.version = 11 : i64} {
  func.func @gru_cell_kernel(%arg0: memref<2x48xf32, #tpu.memory_space<vmem>>, %arg1: memref<2x32xf32, #tpu.memory_space<vmem>>, %arg2: memref<48x128xf32, #tpu.memory_space<vmem>>, %arg3: memref<1x128xf32, #tpu.memory_space<vmem>>, %arg4: memref<2x32xf32, #tpu.memory_space<vmem>>) attributes {dimension_semantics = [], scalar_prefetch = 0 : i64, scratch_operands = 0 : i64, tpu.core_type = #tpu.core_type<tc>} {
    %c0 = arith.constant 0 : index
    %c0_0 = arith.constant 0 : index
    %0 = vector.load %arg1[%c0, %c0_0] : memref<2x32xf32, #tpu.memory_space<vmem>>, vector<2x32xf32>
    %c0_1 = arith.constant 0 : index
    %c0_2 = arith.constant 0 : index
    %1 = vector.load %arg0[%c0_1, %c0_2] : memref<2x48xf32, #tpu.memory_space<vmem>>, vector<2x48xf32>
    %c0_3 = arith.constant 0 : index
    %c0_4 = arith.constant 0 : index
    %2 = vector.load %arg2[%c0_3, %c0_4] : memref<48x128xf32, #tpu.memory_space<vmem>>, vector<48x128xf32>
    %cst = arith.constant dense<0.000000e+00> : vector<2x128xf32>
    %3 = tpu.matmul %1, %2, %cst {dimension_numbers = #tpu.dot_dimension_numbers<[1], [0], [0], [1], [0, 0, 1, 1], [], []>} : vector<2x48xf32>, vector<48x128xf32>, vector<2x128xf32> -> vector<2x128xf32>
    %c0_5 = arith.constant 0 : index
    %c0_6 = arith.constant 0 : index
    %4 = vector.load %arg3[%c0_5, %c0_6] : memref<1x128xf32, #tpu.memory_space<vmem>>, vector<1x128xf32>
    %5 = vector.broadcast %4 : vector<1x128xf32> to vector<2x128xf32>
    %6 = arith.addf %3, %5 : vector<2x128xf32>
    %7 = vector.extract_strided_slice %6 {offsets = [0, 0], sizes = [2, 32], strides = [1, 1]} : vector<2x128xf32> to vector<2x32xf32>
    %8 = vector.extract_strided_slice %6 {offsets = [0, 32], sizes = [2, 32], strides = [1, 1]} : vector<2x128xf32> to vector<2x32xf32>
    %9 = vector.extract_strided_slice %6 {offsets = [0, 64], sizes = [2, 32], strides = [1, 1]} : vector<2x128xf32> to vector<2x32xf32>
    %10 = vector.extract_strided_slice %6 {offsets = [0, 96], sizes = [2, 32], strides = [1, 1]} : vector<2x128xf32> to vector<2x32xf32>
    %11 = arith.negf %7 : vector<2x32xf32>
    %12 = math.exp %11 : vector<2x32xf32>
    %cst_7 = arith.constant 1.000000e+00 : f32
    %13 = vector.broadcast %cst_7 : f32 to vector<2x32xf32>
    %14 = arith.addf %13, %12 : vector<2x32xf32>
    %15 = arith.divf %13, %14 : vector<2x32xf32>
    %16 = arith.negf %8 : vector<2x32xf32>
    %17 = math.exp %16 : vector<2x32xf32>
    %cst_8 = arith.constant 1.000000e+00 : f32
    %18 = vector.broadcast %cst_8 : f32 to vector<2x32xf32>
    %19 = arith.addf %18, %17 : vector<2x32xf32>
    %20 = arith.divf %18, %19 : vector<2x32xf32>
    %21 = arith.mulf %15, %10 : vector<2x32xf32>
    %22 = arith.addf %9, %21 : vector<2x32xf32>
    %23 = math.tanh %22 : vector<2x32xf32>
    %cst_9 = arith.constant 1.000000e+00 : f32
    %24 = vector.broadcast %cst_9 : f32 to vector<2x32xf32>
    %25 = arith.subf %24, %20 : vector<2x32xf32>
    %26 = arith.mulf %25, %23 : vector<2x32xf32>
    %27 = arith.mulf %20, %0 : vector<2x32xf32>
    %28 = arith.addf %26, %27 : vector<2x32xf32>
    %c0_10 = arith.constant 0 : index
    %c0_11 = arith.constant 0 : index
    %29 = vector.load %arg4[%c0_10, %c0_11] : memref<2x32xf32, #tpu.memory_space<vmem>>, vector<2x32xf32>
    tpu.vector_store %arg4[%c0_10, %c0_11], %28 {strides = array<i32>} : memref<2x32xf32, #tpu.memory_space<vmem>>, vector<2x32xf32>,
    return
  }
}

</mosaic_0001>

<bundles_post_ra>
// kernel: basic_net_forward.1
= control target key start
LH: loop header
LB: loop body
LE: loop exit
PB: predicated region body
PF: predicated region fallthrough
CT: control target
= control target key end

     0   :  { %9 = vsyncpa [#allocation3], 0  ;;  %s221_s15 = smov [#allocation2]   ;;  %s269_s0 = inlined_call_operand.vmem [shape: f32[2,48], index: 0, kind: input, shape index: {}]   ;;  %s270_s1 = inlined_call_operand.vmem [shape: f32[2,32], index: 1, kind: input, shape index: {}, may-alias: {1,4}]   ;;  %s271_s2 = inlined_call_operand.hbm [shape: f32[48,128], index: 2, kind: input, shape index: {}]   ;;  %s272_s3 = inlined_call_operand.vmem [shape: f32[1,128], index: 3, kind: input, shape index: {}]   ;;  %s273_s4 = inlined_call_operand.vmem [shape: f32[2,32], index: 4, kind: output, shape index: {}, may-alias: {1,4}]  }
   0x1   :  { %s19_s16 = sshll.u32 %s221_s15, 4  ;;  %s20_s16 = int_to_ptr.vmem [resolvable:$true] %s19_s16 }
   0x2   :  { %s207_s17 = scalar_lea.vmem %s20_s16, 768  ;;  %p212_p1 = scmp.lt.s32.totalorder %s20_s16, %s20_s16 }
   0x3   :  { %p208_p0 = scmp.ne.s32.totalorder %s20_s16, %s207_s17  ;;  %p213_p2 = scmp.lt.s32.totalorder %s207_s17, %s207_s17 }
   0x5   :  { %p214_p3 = por %p213_p2, %p212_p1 }
   0x7   :  { %p215_p4 = pnand %p214_p3, %p208_p0 }
   0x9   :  { %218 = shalt.err (!%p215_p4)
}
   0xa   :  { %s222_s18 = smov 128   ;;  %s223_s19 = smov 8  }
   0xb   :  { %25 = dma.hbm_to_vmem [thread:$0]  %s271_s2, 768, %s20_s16, [#allocation3], %s222_s18, %s222_s18, %s223_s19  }
   0xc   :  { %219 = dma.done.wait [#allocation3], 768  }
   0xd   :  { %220 = vsyncadd [#allocation3], 4294966528  ;;  %v224_v0 = vmov 0.0   ;;  %vm225_vm0 = vmmov 0   ;;  %v38_v1 = vld [vmem:[#allocation2 + $0x28] sm:$0xff]  ;;  %v37_v2 = vld [vmem:[#allocation2 + $0x20] sm:$0xff] }
   0xe   :  { %170 = vmatprep.subr.mxu0 %v224_v0  ;;  %182 = vmatprep.mubr.msk.f32.mxu0 %vm225_vm0, %v224_v0  ;;  %v36_v3 = vld [vmem:[#allocation2 + $0x18] sm:$0xff]  ;;  %v35_v4 = vld [vmem:[#allocation2 + $0x10] sm:$0xff]  ;;  %v34_v5 = vld [vmem:[#allocation2 + $0x8] sm:$0xff]  ;;  %vm46_vm1 = vcmask 392192   ;;  %s226_s25 = smov 32   ;;  %vm153_vm2 = vcmask 254976  }
   0xf   :  { %171 = vmatpush3.msra.mxu0 %v38_v1  ;;  %v33_v6 = vld [vmem:[#allocation2] sm:$0xff] }
  0x10   :  { %172 = vmatprep.subr.mxu0 %v224_v0  ;;  %v32_v7 = vld [vmem:[%s269_s0] sm:$0x3]  ;;  %s227_s0 = smov 64  }
  0x11   :  { %173 = vmatpush3.msra.mxu0 %v37_v2  ;;  %v160_v8 = vld [vmem:[%s272_s3] ss:$0 sm:$0xff]  ;;  %s228_s3 = smov 96  }
  0x12   :  { %174 = vmatprep.subr.mxu0 %v224_v0  ;;  %v31_v21 = vld [vmem:[%s270_s1] sm:$0x3] }
  0x13   :  { %175 = vmatpush3.msra.mxu0 %v36_v3 }
  0x14   :  { %176 = vmatprep.subr.mxu0 %v224_v0 }
  0x15   :  { %177 = vmatpush3.msra.mxu0 %v35_v4 }
  0x16   :  { %178 = vmatprep.subr.mxu0 %v224_v0 }
  0x17   :  { %179 = vmatpush3.msra.mxu0 %v34_v5 }
  0x18   :  { %180 = vmatprep.subr.mxu0 %v224_v0 }
  0x19   :  { %181 = vmatpush3.msra.mxu0 %v33_v6 }
  0x1a   :  { %183 = vmatmul.mubr.msk.f32.vlgmr.msra.gmra.mxu0 %vm46_vm1, %v32_v7 }
  0xda   :  { %v116_v9 = vpop.f32.mrf.mxu0 }
  0xdb   :  { %v117_v10 = vadd.f32 %v160_v8, %v116_v9 }
  0xdc   :  { %v184_v11 = vpop.f32.mrf.mxu0 }
  0xdd   :  { %127 = vrot.lane.b32.xlu0 %v117_v10, %s226_s25  ;;  %v162_v12 = vmul.f32 -1.442695, %v117_v10 }
  0xdf   :  { %193 = vpow2.f32 %v162_v12 }
  0xec   :  { %v194_v13 = vpop.eup %193 }
  0xed   :  { %v123_v14 = vadd.f32 1.0, %v194_v13 }
  0xef   :  { %195 = vrcp.f32 %v123_v14 }
  0xfc   :  { %v196_v15 = vpop.eup %195 }
  0xfd   :  { %v137_v23 = vsub.f32 1.0, %v196_v15 }
 0x14f   :  { %v128_v16 = vpop.permute.xlu0 %127 }
 0x150   :  { %v130_v17 = vmul.f32 %v196_v15, %v128_v16 }
 0x152   :  { %132 = vrot.lane.b32.xlu0 %v130_v17, %s227_s0 }
 0x1c4   :  { %v133_v18 = vpop.permute.xlu0 %132 }
 0x1c5   :  { %v135_v19 = vadd.f32 %v133_v18, %v117_v10 }
 0x1c7   :  { %197 = vtanh.f32 %v135_v19 }
 0x1d4   :  { %v198_v20 = vpop.eup %197 }
 0x1d5   :  { %139 = vrot.lane.b32.xlu1 %v198_v20, %s228_s3 }
 0x1d9   :  { %144 = vrot.lane.b32.xlu1 %v31_v21, %s226_s25 }
 0x247   :  { %v140_v22 = vpop.permute.xlu1 %139 }
 0x248   :  { %v142_v25 = vmul.f32 %v140_v22, %v137_v23 }
 0x24b   :  { %v145_v24 = vpop.permute.xlu1 %144 }
 0x24c   :  { %v147_v26 = vmul.f32 %v196_v15, %v145_v24 }
 0x24e   :  { %v148_v27 = vadd.f32 %v147_v26, %v142_v25 }
 0x250   :  { %150 = vrot.lane.b32.xlu0 %v148_v27, %s228_s3 }
 0x2c2   :  { %v151_v28 = vpop.permute.xlu0 %150 }
 0x2c3   :  { %154 = vst.msk [vmem:[%s273_s4] sm:$0x3] %vm153_vm2, %v151_v28 }
 0x2c4   :  { %159 = vsyncpa [#allocation3], 1 }

</bundles_post_ra>
